<compile_context>
chip_gen: v6e
topology: v6e:2x2x1
jax: 0.10.0
libtpu: 0.0.40
codegen_flags: <defaults>
</compile_context>

<pallas_src>
import functools
import math

import jax
import jax.numpy as jnp
import numpy as np
from jax import lax
from jax.experimental import pallas as pl
from jax.experimental.pallas import tpu as pltpu
from jax.scipy.special import erf as _erf_exact  # used only by the JAX reference


def _erf_approx(x):
    """float32 erf via Abramowitz-Stegun 7.1.26 (|abs err| < 1.5e-7)."""
    # TODO(synk): replace with lax.erf once erf_p has a guaranteed Mosaic lowering.
    a1, a2, a3 = 0.254829592, -0.284496736, 1.421413741
    a4, a5, p = -1.453152027, 1.061405429, 0.3275911
    ax = jnp.abs(x)
    t = 1.0 / (1.0 + p * ax)
    poly = ((((a5 * t + a4) * t + a3) * t + a2) * t + a1) * t
    y = 1.0 - poly * jnp.exp(-(ax * ax))
    return jnp.where(x < 0, -y, y)


def _mha_kernel(x_ref, mask_ref, wqkv_ref, bqkv_ref, wo_ref, bo_ref,
                gamma_ref, beta_ref, o_ref, ctx_ref,
                *, n_heads, d_k, scale, eps):
    # x_ref: (1, S, dm) f32, mask_ref: (1, S, S) int8 (nonzero => masked out)
    # wqkv_ref: (dm, 3*H*d_k), bqkv_ref: (1, 3*H*d_k)
    # wo_ref: (H*d_k, dm), bo/gamma/beta: (1, dm)
    # o_ref: (1, S, dm); ctx_ref: (S, H*d_k) f32 VMEM scratch
    x = x_ref[0]                                       # (S, dm)
    mask = mask_ref[0].astype(jnp.float32)             # (S, S), shared across heads
    hd = n_heads * d_k

    # Fused QKV projection (f32 accumulate).
    qkv = jnp.dot(x, wqkv_ref[...], preferred_element_type=jnp.float32) + bqkv_ref[...]
    q_all = qkv[:, :hd]
    k_all = qkv[:, hd:2 * hd]
    v_all = qkv[:, 2 * hd:]

    neg_big = jnp.float32(-1000000000.0)
    for h in range(n_heads):                           # static, unrolled
        lo = h * d_k
        q_h = q_all[:, lo:lo + d_k].astype(jnp.bfloat16)
        k_h = k_all[:, lo:lo + d_k].astype(jnp.bfloat16)
        v_h = v_all[:, lo:lo + d_k].astype(jnp.bfloat16)

        # scores = Q @ K^T * scale  -- contraction over last dims, no transpose.
        s = lax.dot_general(q_h, k_h, (((1,), (1,)), ((), ())),
                            preferred_element_type=jnp.float32)
        s = s * scale
        s = jnp.where(mask != 0.0, neg_big, s)         # masked_fill_(attn_mask, -1e9)

        # Numerically stable softmax (f32).
        m = jnp.max(s, axis=-1, keepdims=True)
        e = jnp.exp(s - m)
        denom = jnp.sum(e, axis=-1, keepdims=True)

        ctx = lax.dot_general(e.astype(jnp.bfloat16), v_h, (((1,), (0,)), ((), ())),
                              preferred_element_type=jnp.float32)
        # Normalize after attn@V (fewer ops); approx reciprocal runs on the EUP.
        ctx_ref[:, lo:lo + d_k] = ctx * pl.reciprocal(denom, approx=True)

    # Output projection + residual + LayerNorm (all f32).
    out = jnp.dot(ctx_ref[...], wo_ref[...], preferred_element_type=jnp.float32)
    out = out + bo_ref[...] + x
    mu = jnp.mean(out, axis=-1, keepdims=True)
    cent = out - mu
    var = jnp.mean(cent * cent, axis=-1, keepdims=True)
    y = cent * lax.rsqrt(var + eps)
    o_ref[0] = y * gamma_ref[...] + beta_ref[...]


def _ffn_kernel(x_ref, w1_ref, b1_ref, w2_ref, b2_ref, o_ref):
    # x_ref/o_ref: (1, S, dm); w1: (dm, 4dm); b1: (1, 4dm); w2: (4dm, dm); b2: (1, dm)
    x = x_ref[0]
    h = jnp.dot(x, w1_ref[...], preferred_element_type=jnp.float32) + b1_ref[...]
    # gelu(x) = x * 0.5 * (1 + erf(x / sqrt(2)))   (exact-form gelu from the module)
    h = h * 0.5 * (1.0 + _erf_approx(h * 0.7071067811865476))
    o_ref[0] = jnp.dot(h, w2_ref[...], preferred_element_type=jnp.float32) + b2_ref[...]


@functools.partial(jax.jit, static_argnames=("d_model", "n_heads"))
def encoder_layer_forward(params, enc_inputs, enc_self_attn_mask, *, d_model, n_heads):
    """enc_inputs: (B, S, d_model) f32; enc_self_attn_mask: (B, S, S) bool (True => mask)."""
    B, S, dm = enc_inputs.shape
    d_k = 2 * d_model
    hd = n_heads * d_k

    # Pack the three projections into one matmul; mask shipped once per batch as int8.
    wqkv = jnp.concatenate([params["wq"], params["wk"], params["wv"]], axis=1)   # (dm, 3hd)
    bqkv = jnp.concatenate([params["bq"], params["bk"], params["bv"]]).reshape(1, 3 * hd)
    mask_i8 = enc_self_attn_mask.astype(jnp.int8)                                # (B, S, S)
    scale = float(1.0 / math.sqrt(d_model * 2))

    mha_kernel = functools.partial(_mha_kernel, n_heads=n_heads, d_k=d_k,
                                   scale=scale, eps=1e-5)

    mha_out = pl.pallas_call(
        mha_kernel,
        out_shape=jax.ShapeDtypeStruct((B, S, dm), jnp.float32),
        grid_spec=pltpu.PrefetchScalarGridSpec(
            num_scalar_prefetch=0,
            grid=(B,),
            in_specs=[
                pl.BlockSpec((1, S, dm), lambda b: (b, 0, 0)),     # x
                pl.BlockSpec((1, S, S), lambda b: (b, 0, 0)),      # mask (int8, head-shared)
                pl.BlockSpec((dm, 3 * hd), lambda b: (0, 0)),      # Wqkv (resident)
                pl.BlockSpec((1, 3 * hd), lambda b: (0, 0)),       # bqkv
                pl.BlockSpec((hd, dm), lambda b: (0, 0)),          # Wo
                pl.BlockSpec((1, dm), lambda b: (0, 0)),           # bo
                pl.BlockSpec((1, dm), lambda b: (0, 0)),           # ln gamma
                pl.BlockSpec((1, dm), lambda b: (0, 0)),           # ln beta
            ],
            out_specs=pl.BlockSpec((1, S, dm), lambda b: (b, 0, 0)),
            scratch_shapes=[pltpu.VMEM((S, hd), jnp.float32)],     # lane-dense head concat
        ),
        compiler_params=pltpu.CompilerParams(dimension_semantics=("parallel",)),
    )(enc_inputs, mask_i8, wqkv, bqkv, params["wo"],
      params["bo"].reshape(1, dm), params["gamma"].reshape(1, dm),
      params["beta"].reshape(1, dm))

    ffn_out = pl.pallas_call(
        _ffn_kernel,
        out_shape=jax.ShapeDtypeStruct((B, S, dm), jnp.float32),
        grid_spec=pltpu.PrefetchScalarGridSpec(
            num_scalar_prefetch=0,
            grid=(B,),
            in_specs=[
                pl.BlockSpec((1, S, dm), lambda b: (b, 0, 0)),     # LN output
                pl.BlockSpec((dm, 4 * dm), lambda b: (0, 0)),      # W1 (resident)
                pl.BlockSpec((1, 4 * dm), lambda b: (0, 0)),       # b1
                pl.BlockSpec((4 * dm, dm), lambda b: (0, 0)),      # W2
                pl.BlockSpec((1, dm), lambda b: (0, 0)),           # b2
            ],
            out_specs=pl.BlockSpec((1, S, dm), lambda b: (b, 0, 0)),
        ),
        compiler_params=pltpu.CompilerParams(dimension_semantics=("parallel",)),
    )(mha_out, params["w1"], params["b1"].reshape(1, 4 * dm),
      params["w2"], params["b2"].reshape(1, dm))

    return ffn_out


# ----------------------------- reference & test -----------------------------

def init_params(key, d_model, n_heads):
    d_k = 2 * d_model
    hd = n_heads * d_k
    ks = jax.random.split(key, 12)

    def linear(kw, kb, fan_in, fan_out):
        bound = 1.0 / math.sqrt(fan_in)
        w = jax.random.uniform(kw, (fan_in, fan_out), jnp.float32, -bound, bound)
        b = jax.random.uniform(kb, (fan_out,), jnp.float32, -bound, bound)
        return w, b

    wq, bq = linear(ks[0], ks[1], d_model, hd)
    wk, bk = linear(ks[2], ks[3], d_model, hd)
    wv, bv = linear(ks[4], ks[5], d_model, hd)
    wo, bo = linear(ks[6], ks[7], hd, d_model)
    w1, b1 = linear(ks[8], ks[9], d_model, 4 * d_model)
    w2, b2 = linear(ks[10], ks[11], 4 * d_model, d_model)
    return dict(wq=wq, bq=bq, wk=wk, bk=bk, wv=wv, bv=bv, wo=wo, bo=bo,
                gamma=jnp.ones((d_model,), jnp.float32),
                beta=jnp.zeros((d_model,), jnp.float32),
                w1=w1, b1=b1, w2=w2, b2=b2)


def _reference_forward(params, x, attn_mask, d_model, n_heads):
    """Plain-JAX f32 replica of EncoderLayer.forward (PyTorch semantics)."""
    B, S, dm = x.shape
    d_k = 2 * d_model
    q = (x @ params["wq"] + params["bq"]).reshape(B, S, n_heads, d_k).transpose(0, 2, 1, 3)
    k = (x @ params["wk"] + params["bk"]).reshape(B, S, n_heads, d_k).transpose(0, 2, 1, 3)
    v = (x @ params["wv"] + params["bv"]).reshape(B, S, n_heads, d_k).transpose(0, 2, 1, 3)
    scores = jnp.einsum("bhqd,bhkd->bhqk", q, k) / np.sqrt(d_model * 2)
    scores = jnp.where(attn_mask[:, None, :, :], -1000000000.0, scores)
    attn = jax.nn.softmax(scores, axis=-1)
    ctx = jnp.einsum("bhqk,bhkd->bhqd", attn, v)
    ctx = ctx.transpose(0, 2, 1, 3).reshape(B, S, n_heads * d_k)
    out = ctx @ params["wo"] + params["bo"] + x
    mu = out.mean(-1, keepdims=True)
    var = ((out - mu) ** 2).mean(-1, keepdims=True)
    out = (out - mu) / jnp.sqrt(var + 1e-5) * params["gamma"] + params["beta"]
    h = out @ params["w1"] + params["b1"]
    h = h * 0.5 * (1.0 + _erf_exact(h / np.sqrt(2.0)))
    return h @ params["w2"] + params["b2"]


if __name__ == "__main__":
    d_model, n_heads = 32, 2
    B, S = 2, 8

    key = jax.random.PRNGKey(0)
    kp, kx = jax.random.split(key)
    params = init_params(kp, d_model, n_heads)
    enc_inputs = jax.random.normal(kx, (B, S, d_model), dtype=jnp.float32)

    # Deterministic padding-style self-attention mask: last 2 key positions masked.
    key_pad = jnp.arange(S) >= (S - 2)                              # (S,)
    enc_self_attn_mask = jnp.broadcast_to(key_pad[None, None, :], (B, S, S))

    out = encoder_layer_forward(params, enc_inputs, enc_self_attn_mask,
                                d_model=d_model, n_heads=n_heads)
    out = jax.block_until_ready(out)

    ref = _reference_forward(params, enc_inputs, enc_self_attn_mask, d_model, n_heads)
    # Tolerance accounts for bf16 MXU operands (f32 accumulation) and the
    # approximate EUP reciprocal used in the softmax normalization.
    np.testing.assert_allclose(np.asarray(out), np.asarray(ref), rtol=2e-2, atol=2e-2)
    print("KERNEL_OK")
</pallas_src>

<mosaic_0001>
module attributes {stable_mosaic.version = 11 : i64} {
  func.func @_ffn_kernel(%arg0: i32, %arg1: memref<1x8x32xf32, #tpu.memory_space<vmem>>, %arg2: memref<32x128xf32, #tpu.memory_space<vmem>>, %arg3: memref<1x128xf32, #tpu.memory_space<vmem>>, %arg4: memref<128x32xf32, #tpu.memory_space<vmem>>, %arg5: memref<1x32xf32, #tpu.memory_space<vmem>>, %arg6: memref<1x8x32xf32, #tpu.memory_space<vmem>>) attributes {dimension_semantics = [#tpu.dimension_semantics<parallel>], iteration_bounds = array<i64: 2>, scalar_prefetch = 0 : i64, scratch_operands = 0 : i64, tpu.core_type = #tpu.core_type<tc>, window_params = [{transform_indices = @transform_0, window_bounds = array<i64: 1, 8, 32>}, {pipeline_mode = #tpu.pipeline_mode<synchronous>, transform_indices = @transform_1, window_bounds = array<i64: 32, 128>}, {pipeline_mode = #tpu.pipeline_mode<synchronous>, transform_indices = @transform_2, window_bounds = array<i64: 1, 128>}, {pipeline_mode = #tpu.pipeline_mode<synchronous>, transform_indices = @transform_3, window_bounds = array<i64: 128, 32>}, {pipeline_mode = #tpu.pipeline_mode<synchronous>, transform_indices = @transform_4, window_bounds = array<i64: 1, 32>}, {transform_indices = @transform_5, window_bounds = array<i64: 1, 8, 32>}]} {
    %c0 = arith.constant 0 : index
    %c0_0 = arith.constant 0 : index
    %c0_1 = arith.constant 0 : index
    %0 = vector.load %arg1[%c0, %c0_0, %c0_1] : memref<1x8x32xf32, #tpu.memory_space<vmem>>, vector<1x8x32xf32>
    %1 = vector.shape_cast %0 : vector<1x8x32xf32> to vector<8x32xf32>
    %c0_2 = arith.constant 0 : index
    %c0_3 = arith.constant 0 : index
    %2 = vector.load %arg2[%c0_2, %c0_3] : memref<32x128xf32, #tpu.memory_space<vmem>>, vector<32x128xf32>
    %cst = arith.constant dense<0.000000e+00> : vector<8x128xf32>
    %3 = tpu.matmul %1, %2, %cst {dimension_numbers = #tpu.dot_dimension_numbers<[1], [0], [0], [1], [0, 0, 1, 1], [], []>} : vector<8x32xf32>, vector<32x128xf32>, vector<8x128xf32> -> vector<8x128xf32>
    %c0_4 = arith.constant 0 : index
    %c0_5 = arith.constant 0 : index
    %4 = vector.load %arg3[%c0_4, %c0_5] : memref<1x128xf32, #tpu.memory_space<vmem>>, vector<1x128xf32>
    %5 = vector.broadcast %4 : vector<1x128xf32> to vector<8x128xf32>
    %6 = arith.addf %3, %5 : vector<8x128xf32>
    %cst_6 = arith.constant 5.000000e-01 : f32
    %7 = vector.broadcast %cst_6 : f32 to vector<8x128xf32>
    %8 = arith.mulf %6, %7 : vector<8x128xf32>
    %cst_7 = arith.constant 0.707106769 : f32
    %9 = vector.broadcast %cst_7 : f32 to vector<8x128xf32>
    %10 = arith.mulf %6, %9 : vector<8x128xf32>
    %11 = math.absf %10 : vector<8x128xf32>
    %cst_8 = arith.constant 0.327591091 : f32
    %12 = vector.broadcast %cst_8 : f32 to vector<8x128xf32>
    %13 = arith.mulf %12, %11 : vector<8x128xf32>
    %cst_9 = arith.constant 1.000000e+00 : f32
    %14 = vector.broadcast %cst_9 : f32 to vector<8x128xf32>
    %15 = arith.addf %14, %13 : vector<8x128xf32>
    %cst_10 = arith.constant 1.000000e+00 : f32
    %16 = vector.broadcast %cst_10 : f32 to vector<8x128xf32>
    %17 = arith.divf %16, %15 : vector<8x128xf32>
    %cst_11 = arith.constant 1.06140542 : f32
    %18 = vector.broadcast %cst_11 : f32 to vector<8x128xf32>
    %19 = arith.mulf %18, %17 : vector<8x128xf32>
    %cst_12 = arith.constant -1.45315206 : f32
    %20 = vector.broadcast %cst_12 : f32 to vector<8x128xf32>
    %21 = arith.addf %19, %20 : vector<8x128xf32>
    %22 = arith.mulf %21, %17 : vector<8x128xf32>
    %cst_13 = arith.constant 1.42141378 : f32
    %23 = vector.broadcast %cst_13 : f32 to vector<8x128xf32>
    %24 = arith.addf %22, %23 : vector<8x128xf32>
    %25 = arith.mulf %24, %17 : vector<8x128xf32>
    %cst_14 = arith.constant -0.284496725 : f32
    %26 = vector.broadcast %cst_14 : f32 to vector<8x128xf32>
    %27 = arith.addf %25, %26 : vector<8x128xf32>
    %28 = arith.mulf %27, %17 : vector<8x128xf32>
    %cst_15 = arith.constant 0.254829586 : f32
    %29 = vector.broadcast %cst_15 : f32 to vector<8x128xf32>
    %30 = arith.addf %28, %29 : vector<8x128xf32>
    %31 = arith.mulf %30, %17 : vector<8x128xf32>
    %32 = arith.mulf %11, %11 : vector<8x128xf32>
    %cst_16 = arith.constant 0.000000e+00 : f32
    %33 = vector.broadcast %cst_16 : f32 to vector<8x128xf32>
    %34 = arith.subf %33, %32 : vector<8x128xf32>
    %35 = math.exp %34 : vector<8x128xf32>
    %36 = arith.mulf %31, %35 : vector<8x128xf32>
    %cst_17 = arith.constant 1.000000e+00 : f32
    %37 = vector.broadcast %cst_17 : f32 to vector<8x128xf32>
    %38 = arith.subf %37, %36 : vector<8x128xf32>
    %cst_18 = arith.constant 0.000000e+00 : f32
    %39 = vector.broadcast %cst_18 : f32 to vector<8x128xf32>
    %40 = arith.cmpf olt, %10, %39 : vector<8x128xf32>
    %cst_19 = arith.constant 0.000000e+00 : f32
    %41 = vector.broadcast %cst_19 : f32 to vector<8x128xf32>
    %42 = arith.subf %41, %38 : vector<8x128xf32>
    %43 = arith.select %40, %42, %38 : vector<8x128xi1>, vector<8x128xf32>
    %cst_20 = arith.constant 1.000000e+00 : f32
    %44 = vector.broadcast %cst_20 : f32 to vector<8x128xf32>
    %45 = arith.addf %44, %43 : vector<8x128xf32>
    %46 = arith.mulf %8, %45 : vector<8x128xf32>
    %c0_21 = arith.constant 0 : index
    %c0_22 = arith.constant 0 : index
    %47 = vector.load %arg4[%c0_21, %c0_22] : memref<128x32xf32, #tpu.memory_space<vmem>>, vector<128x32xf32>
    %cst_23 = arith.constant dense<0.000000e+00> : vector<8x32xf32>
    %48 = tpu.matmul %46, %47, %cst_23 {dimension_numbers = #tpu.dot_dimension_numbers<[1], [0], [0], [1], [0, 0, 1, 1], [], []>} : vector<8x128xf32>, vector<128x32xf32>, vector<8x32xf32> -> vector<8x32xf32>
    %c0_24 = arith.constant 0 : index
    %c0_25 = arith.constant 0 : index
    %49 = vector.load %arg5[%c0_24, %c0_25] : memref<1x32xf32, #tpu.memory_space<vmem>>, vector<1x32xf32>
    %50 = vector.broadcast %49 : vector<1x32xf32> to vector<8x32xf32>
    %51 = arith.addf %48, %50 : vector<8x32xf32>
    %c0_26 = arith.constant 0 : index
    %c0_27 = arith.constant 0 : index
    %c0_28 = arith.constant 0 : index
    %52 = vector.load %arg6[%c0_26, %c0_27, %c0_28] : memref<1x8x32xf32, #tpu.memory_space<vmem>>, vector<1x8x32xf32>
    %53 = vector.shape_cast %52 : vector<1x8x32xf32> to vector<8x32xf32>
    %54 = vector.shape_cast %51 : vector<8x32xf32> to vector<1x8x32xf32>
    tpu.vector_store %arg6[%c0_26, %c0_27, %c0_28], %54 {strides = array<i32>} : memref<1x8x32xf32, #tpu.memory_space<vmem>>, vector<1x8x32xf32>,
    return
  }
  func.func @transform_0(%arg0: i32) -> (i32, i32, i32) {
    %c0_i32 = arith.constant 0 : i32
    %c0_i32_0 = arith.constant 0 : i32
    %c0_i32_1 = arith.constant 0 : i32
    return %arg0, %c0_i32, %c0_i32_0 : i32, i32, i32
  }
  func.func @transform_1(%arg0: i32) -> (i32, i32) {
    %c0_i32 = arith.constant 0 : i32
    %c0_i32_0 = arith.constant 0 : i32
    %c0_i32_1 = arith.constant 0 : i32
    return %c0_i32, %c0_i32_0 : i32, i32
  }
  func.func @transform_2(%arg0: i32) -> (i32, i32) {
    %c0_i32 = arith.constant 0 : i32
    %c0_i32_0 = arith.constant 0 : i32
    %c0_i32_1 = arith.constant 0 : i32
    return %c0_i32, %c0_i32_0 : i32, i32
  }
  func.func @transform_3(%arg0: i32) -> (i32, i32) {
    %c0_i32 = arith.constant 0 : i32
    %c0_i32_0 = arith.constant 0 : i32
    %c0_i32_1 = arith.constant 0 : i32
    return %c0_i32, %c0_i32_0 : i32, i32
  }
  func.func @transform_4(%arg0: i32) -> (i32, i32) {
    %c0_i32 = arith.constant 0 : i32
    %c0_i32_0 = arith.constant 0 : i32
    %c0_i32_1 = arith.constant 0 : i32
    return %c0_i32, %c0_i32_0 : i32, i32
  }
  func.func @transform_5(%arg0: i32) -> (i32, i32, i32) {
    %c0_i32 = arith.constant 0 : i32
    %c0_i32_0 = arith.constant 0 : i32
    %c0_i32_1 = arith.constant 0 : i32
    return %arg0, %c0_i32, %c0_i32_0 : i32, i32, i32
  }
}

module attributes {stable_mosaic.version = 11 : i64} {
  func.func @_mha_kernel(%arg0: i32, %arg1: memref<1x8x32xf32, #tpu.memory_space<vmem>>, %arg2: memref<1x8x8xi8, #tpu.memory_space<vmem>>, %arg3: memref<32x384xf32, #tpu.memory_space<vmem>>, %arg4: memref<1x384xf32, #tpu.memory_space<vmem>>, %arg5: memref<128x32xf32, #tpu.memory_space<vmem>>, %arg6: memref<1x32xf32, #tpu.memory_space<vmem>>, %arg7: memref<1x32xf32, #tpu.memory_space<vmem>>, %arg8: memref<1x32xf32, #tpu.memory_space<vmem>>, %arg9: memref<1x8x32xf32, #tpu.memory_space<vmem>>, %arg10: memref<8x128xf32, #tpu.memory_space<vmem>>) attributes {dimension_semantics = [#tpu.dimension_semantics<parallel>], iteration_bounds = array<i64: 2>, scalar_prefetch = 0 : i64, scratch_operands = 1 : i64, tpu.core_type = #tpu.core_type<tc>, window_params = [{transform_indices = @transform_0, window_bounds = array<i64: 1, 8, 32>}, {transform_indices = @transform_1, window_bounds = array<i64: 1, 8, 8>}, {pipeline_mode = #tpu.pipeline_mode<synchronous>, transform_indices = @transform_2, window_bounds = array<i64: 32, 384>}, {pipeline_mode = #tpu.pipeline_mode<synchronous>, transform_indices = @transform_3, window_bounds = array<i64: 1, 384>}, {pipeline_mode = #tpu.pipeline_mode<synchronous>, transform_indices = @transform_4, window_bounds = array<i64: 128, 32>}, {pipeline_mode = #tpu.pipeline_mode<synchronous>, transform_indices = @transform_5, window_bounds = array<i64: 1, 32>}, {pipeline_mode = #tpu.pipeline_mode<synchronous>, transform_indices = @transform_6, window_bounds = array<i64: 1, 32>}, {pipeline_mode = #tpu.pipeline_mode<synchronous>, transform_indices = @transform_7, window_bounds = array<i64: 1, 32>}, {transform_indices = @transform_8, window_bounds = array<i64: 1, 8, 32>}]} {
    %c0 = arith.constant 0 : index
    %c0_0 = arith.constant 0 : index
    %c0_1 = arith.constant 0 : index
    %0 = vector.load %arg1[%c0, %c0_0, %c0_1] : memref<1x8x32xf32, #tpu.memory_space<vmem>>, vector<1x8x32xf32>
    %1 = vector.shape_cast %0 : vector<1x8x32xf32> to vector<8x32xf32>
    %c0_2 = arith.constant 0 : index
    %c0_3 = arith.constant 0 : index
    %c0_4 = arith.constant 0 : index
    %2 = vector.load %arg2[%c0_2, %c0_3, %c0_4] : memref<1x8x8xi8, #tpu.memory_space<vmem>>, vector<1x8x8xi8>
    %3 = vector.shape_cast %2 : vector<1x8x8xi8> to vector<8x8xi8>
    %4 = arith.sitofp %3 : vector<8x8xi8> to vector<8x8xf32>
    %c0_5 = arith.constant 0 : index
    %c0_6 = arith.constant 0 : index
    %5 = vector.load %arg3[%c0_5, %c0_6] : memref<32x384xf32, #tpu.memory_space<vmem>>, vector<32x384xf32>
    %cst = arith.constant dense<0.000000e+00> : vector<8x384xf32>
    %6 = tpu.matmul %1, %5, %cst {dimension_numbers = #tpu.dot_dimension_numbers<[1], [0], [0], [1], [0, 0, 1, 1], [], []>} : vector<8x32xf32>, vector<32x384xf32>, vector<8x384xf32> -> vector<8x384xf32>
    %c0_7 = arith.constant 0 : index
    %c0_8 = arith.constant 0 : index
    %7 = vector.load %arg4[%c0_7, %c0_8] : memref<1x384xf32, #tpu.memory_space<vmem>>, vector<1x384xf32>
    %8 = vector.broadcast %7 : vector<1x384xf32> to vector<8x384xf32>
    %9 = arith.addf %6, %8 : vector<8x384xf32>
    %10 = vector.extract_strided_slice %9 {offsets = [0, 0], sizes = [8, 128], strides = [1, 1]} : vector<8x384xf32> to vector<8x128xf32>
    %11 = vector.extract_strided_slice %9 {offsets = [0, 128], sizes = [8, 128], strides = [1, 1]} : vector<8x384xf32> to vector<8x128xf32>
    %12 = vector.extract_strided_slice %9 {offsets = [0, 256], sizes = [8, 128], strides = [1, 1]} : vector<8x384xf32> to vector<8x128xf32>
    %13 = vector.extract_strided_slice %10 {offsets = [0, 0], sizes = [8, 64], strides = [1, 1]} : vector<8x128xf32> to vector<8x64xf32>
    %14 = arith.truncf %13 : vector<8x64xf32> to vector<8x64xbf16>
    %15 = vector.extract_strided_slice %11 {offsets = [0, 0], sizes = [8, 64], strides = [1, 1]} : vector<8x128xf32> to vector<8x64xf32>
    %16 = arith.truncf %15 : vector<8x64xf32> to vector<8x64xbf16>
    %17 = vector.extract_strided_slice %12 {offsets = [0, 0], sizes = [8, 64], strides = [1, 1]} : vector<8x128xf32> to vector<8x64xf32>
    %18 = arith.truncf %17 : vector<8x64xf32> to vector<8x64xbf16>
    %cst_9 = arith.constant dense<0.000000e+00> : vector<8x8xf32>
    %19 = tpu.matmul %14, %16, %cst_9 {dimension_numbers = #tpu.dot_dimension_numbers<[1], [1], [0], [0], [0, 0, 1, 0], [], []>} : vector<8x64xbf16>, vector<8x64xbf16>, vector<8x8xf32> -> vector<8x8xf32>
    %cst_10 = arith.constant 1.250000e-01 : f32
    %20 = vector.broadcast %cst_10 : f32 to vector<8x8xf32>
    %21 = arith.mulf %19, %20 : vector<8x8xf32>
    %cst_11 = arith.constant 0.000000e+00 : f32
    %22 = vector.broadcast %cst_11 : f32 to vector<8x8xf32>
    %23 = arith.cmpf one, %4, %22 : vector<8x8xf32>
    %cst_12 = arith.constant -1.000000e+09 : f32
    %24 = vector.broadcast %cst_12 : f32 to vector<8x8xf32>
    %25 = arith.select %23, %24, %21 : vector<8x8xi1>, vector<8x8xf32>
    %cst_13 = arith.constant dense<0xFF800000> : vector<8xf32>
    %26 = vector.multi_reduction <maximumf>, %25, %cst_13 [1] : vector<8x8xf32> to vector<8xf32>
    %27 = vector.shape_cast %26 : vector<8xf32> to vector<8x1xf32>
    %28 = vector.broadcast %27 : vector<8x1xf32> to vector<8x8xf32>
    %29 = arith.subf %25, %28 : vector<8x8xf32>
    %30 = math.exp %29 : vector<8x8xf32>
    %cst_14 = arith.constant dense<0.000000e+00> : vector<8xf32>
    %31 = vector.multi_reduction <add>, %30, %cst_14 [1] : vector<8x8xf32> to vector<8xf32>
    %32 = vector.shape_cast %31 : vector<8xf32> to vector<8x1xf32>
    %33 = arith.truncf %30 : vector<8x8xf32> to vector<8x8xbf16>
    %cst_15 = arith.constant dense<0.000000e+00> : vector<8x64xf32>
    %34 = tpu.matmul %33, %18, %cst_15 {dimension_numbers = #tpu.dot_dimension_numbers<[1], [0], [0], [1], [0, 0, 1, 1], [], []>} : vector<8x8xbf16>, vector<8x64xbf16>, vector<8x64xf32> -> vector<8x64xf32>
    %35 = tpu.reciprocal %32 {approx = true} : vector<8x1xf32> -> vector<8x1xf32>
    %36 = vector.broadcast %35 : vector<8x1xf32> to vector<8x64xf32>
    %37 = arith.mulf %34, %36 : vector<8x64xf32>
    %c0_16 = arith.constant 0 : index
    %c0_17 = arith.constant 0 : index
    %38 = vector.load %arg10[%c0_16, %c0_17] : memref<8x128xf32, #tpu.memory_space<vmem>>, vector<8x64xf32>
    tpu.vector_store %arg10[%c0_16, %c0_17], %37 {strides = array<i32>} : memref<8x128xf32, #tpu.memory_space<vmem>>, vector<8x64xf32>,
    %39 = vector.extract_strided_slice %10 {offsets = [0, 64], sizes = [8, 64], strides = [1, 1]} : vector<8x128xf32> to vector<8x64xf32>
    %40 = arith.truncf %39 : vector<8x64xf32> to vector<8x64xbf16>
    %41 = vector.extract_strided_slice %11 {offsets = [0, 64], sizes = [8, 64], strides = [1, 1]} : vector<8x128xf32> to vector<8x64xf32>
    %42 = arith.truncf %41 : vector<8x64xf32> to vector<8x64xbf16>
    %43 = vector.extract_strided_slice %12 {offsets = [0, 64], sizes = [8, 64], strides = [1, 1]} : vector<8x128xf32> to vector<8x64xf32>
    %44 = arith.truncf %43 : vector<8x64xf32> to vector<8x64xbf16>
    %cst_18 = arith.constant dense<0.000000e+00> : vector<8x8xf32>
    %45 = tpu.matmul %40, %42, %cst_18 {dimension_numbers = #tpu.dot_dimension_numbers<[1], [1], [0], [0], [0, 0, 1, 0], [], []>} : vector<8x64xbf16>, vector<8x64xbf16>, vector<8x8xf32> -> vector<8x8xf32>
    %cst_19 = arith.constant 1.250000e-01 : f32
    %46 = vector.broadcast %cst_19 : f32 to vector<8x8xf32>
    %47 = arith.mulf %45, %46 : vector<8x8xf32>
    %cst_20 = arith.constant 0.000000e+00 : f32
    %48 = vector.broadcast %cst_20 : f32 to vector<8x8xf32>
    %49 = arith.cmpf one, %4, %48 : vector<8x8xf32>
    %cst_21 = arith.constant -1.000000e+09 : f32
    %50 = vector.broadcast %cst_21 : f32 to vector<8x8xf32>
    %51 = arith.select %49, %50, %47 : vector<8x8xi1>, vector<8x8xf32>
    %cst_22 = arith.constant dense<0xFF800000> : vector<8xf32>
    %52 = vector.multi_reduction <maximumf>, %51, %cst_22 [1] : vector<8x8xf32> to vector<8xf32>
    %53 = vector.shape_cast %52 : vector<8xf32> to vector<8x1xf32>
    %54 = vector.broadcast %53 : vector<8x1xf32> to vector<8x8xf32>
    %55 = arith.subf %51, %54 : vector<8x8xf32>
    %56 = math.exp %55 : vector<8x8xf32>
    %cst_23 = arith.constant dense<0.000000e+00> : vector<8xf32>
    %57 = vector.multi_reduction <add>, %56, %cst_23 [1] : vector<8x8xf32> to vector<8xf32>
    %58 = vector.shape_cast %57 : vector<8xf32> to vector<8x1xf32>
    %59 = arith.truncf %56 : vector<8x8xf32> to vector<8x8xbf16>
    %cst_24 = arith.constant dense<0.000000e+00> : vector<8x64xf32>
    %60 = tpu.matmul %59, %44, %cst_24 {dimension_numbers = #tpu.dot_dimension_numbers<[1], [0], [0], [1], [0, 0, 1, 1], [], []>} : vector<8x8xbf16>, vector<8x64xbf16>, vector<8x64xf32> -> vector<8x64xf32>
    %61 = tpu.reciprocal %58 {approx = true} : vector<8x1xf32> -> vector<8x1xf32>
    %62 = vector.broadcast %61 : vector<8x1xf32> to vector<8x64xf32>
    %63 = arith.mulf %60, %62 : vector<8x64xf32>
    %c0_25 = arith.constant 0 : index
    %c64 = arith.constant 64 : index
    %64 = vector.load %arg10[%c0_25, %c64] : memref<8x128xf32, #tpu.memory_space<vmem>>, vector<8x64xf32>
    tpu.vector_store %arg10[%c0_25, %c64], %63 {strides = array<i32>} : memref<8x128xf32, #tpu.memory_space<vmem>>, vector<8x64xf32>,
    %c0_26 = arith.constant 0 : index
    %c0_27 = arith.constant 0 : index
    %65 = vector.load %arg10[%c0_26, %c0_27] : memref<8x128xf32, #tpu.memory_space<vmem>>, vector<8x128xf32>
    %c0_28 = arith.constant 0 : index
    %c0_29 = arith.constant 0 : index
    %66 = vector.load %arg5[%c0_28, %c0_29] : memref<128x32xf32, #tpu.memory_space<vmem>>, vector<128x32xf32>
    %cst_30 = arith.constant dense<0.000000e+00> : vector<8x32xf32>
    %67 = tpu.matmul %65, %66, %cst_30 {dimension_numbers = #tpu.dot_dimension_numbers<[1], [0], [0], [1], [0, 0, 1, 1], [], []>} : vector<8x128xf32>, vector<128x32xf32>, vector<8x32xf32> -> vector<8x32xf32>
    %c0_31 = arith.constant 0 : index
    %c0_32 = arith.constant 0 : index
    %68 = vector.load %arg6[%c0_31, %c0_32] : memref<1x32xf32, #tpu.memory_space<vmem>>, vector<1x32xf32>
    %69 = vector.broadcast %68 : vector<1x32xf32> to vector<8x32xf32>
    %70 = arith.addf %67, %69 : vector<8x32xf32>
    %71 = arith.addf %70, %1 : vector<8x32xf32>
    %cst_33 = arith.constant dense<0.000000e+00> : vector<8xf32>
    %72 = vector.multi_reduction <add>, %71, %cst_33 [1] : vector<8x32xf32> to vector<8xf32>
    %73 = vector.shape_cast %72 : vector<8xf32> to vector<8x1xf32>
    %cst_34 = arith.constant 3.200000e+01 : f32
    %74 = vector.broadcast %cst_34 : f32 to vector<8x1xf32>
    %75 = arith.divf %73, %74 : vector<8x1xf32>
    %76 = vector.broadcast %75 : vector<8x1xf32> to vector<8x32xf32>
    %77 = arith.subf %71, %76 : vector<8x32xf32>
    %78 = arith.mulf %77, %77 : vector<8x32xf32>
    %cst_35 = arith.constant dense<0.000000e+00> : vector<8xf32>
    %79 = vector.multi_reduction <add>, %78, %cst_35 [1] : vector<8x32xf32> to vector<8xf32>
    %80 = vector.shape_cast %79 : vector<8xf32> to vector<8x1xf32>
    %cst_36 = arith.constant 3.200000e+01 : f32
    %81 = vector.broadcast %cst_36 : f32 to vector<8x1xf32>
    %82 = arith.divf %80, %81 : vector<8x1xf32>
    %cst_37 = arith.constant 9.99999974E-6 : f32
    %83 = vector.broadcast %cst_37 : f32 to vector<8x1xf32>
    %84 = arith.addf %82, %83 : vector<8x1xf32>
    %85 = math.rsqrt %84 : vector<8x1xf32>
    %86 = vector.broadcast %85 : vector<8x1xf32> to vector<8x32xf32>
    %87 = arith.mulf %77, %86 : vector<8x32xf32>
    %c0_38 = arith.constant 0 : index
    %c0_39 = arith.constant 0 : index
    %88 = vector.load %arg7[%c0_38, %c0_39] : memref<1x32xf32, #tpu.memory_space<vmem>>, vector<1x32xf32>
    %89 = vector.broadcast %88 : vector<1x32xf32> to vector<8x32xf32>
    %90 = arith.mulf %87, %89 : vector<8x32xf32>
    %c0_40 = arith.constant 0 : index
    %c0_41 = arith.constant 0 : index
    %91 = vector.load %arg8[%c0_40, %c0_41] : memref<1x32xf32, #tpu.memory_space<vmem>>, vector<1x32xf32>
    %92 = vector.broadcast %91 : vector<1x32xf32> to vector<8x32xf32>
    %93 = arith.addf %90, %92 : vector<8x32xf32>
    %c0_42 = arith.constant 0 : index
    %c0_43 = arith.constant 0 : index
    %c0_44 = arith.constant 0 : index
    %94 = vector.load %arg9[%c0_42, %c0_43, %c0_44] : memref<1x8x32xf32, #tpu.memory_space<vmem>>, vector<1x8x32xf32>
    %95 = vector.shape_cast %94 : vector<1x8x32xf32> to vector<8x32xf32>
    %96 = vector.shape_cast %93 : vector<8x32xf32> to vector<1x8x32xf32>
    tpu.vector_store %arg9[%c0_42, %c0_43, %c0_44], %96 {strides = array<i32>} : memref<1x8x32xf32, #tpu.memory_space<vmem>>, vector<1x8x32xf32>,
    return
  }
  func.func @transform_0(%arg0: i32) -> (i32, i32, i32) {
    %c0_i32 = arith.constant 0 : i32
    %c0_i32_0 = arith.constant 0 : i32
    %c0_i32_1 = arith.constant 0 : i32
    return %arg0, %c0_i32, %c0_i32_0 : i32, i32, i32
  }
  func.func @transform_1(%arg0: i32) -> (i32, i32, i32) {
    %c0_i32 = arith.constant 0 : i32
    %c0_i32_0 = arith.constant 0 : i32
    %c0_i32_1 = arith.constant 0 : i32
    return %arg0, %c0_i32, %c0_i32_0 : i32, i32, i32
  }
  func.func @transform_2(%arg0: i32) -> (i32, i32) {
    %c0_i32 = arith.constant 0 : i32
    %c0_i32_0 = arith.constant 0 : i32
    %c0_i32_1 = arith.constant 0 : i32
    return %c0_i32, %c0_i32_0 : i32, i32
  }
  func.func @transform_3(%arg0: i32) -> (i32, i32) {
    %c0_i32 = arith.constant 0 : i32
    %c0_i32_0 = arith.constant 0 : i32
    %c0_i32_1 = arith.constant 0 : i32
    return %c0_i32, %c0_i32_0 : i32, i32
  }
  func.func @transform_4(%arg0: i32) -> (i32, i32) {
    %c0_i32 = arith.constant 0 : i32
    %c0_i32_0 = arith.constant 0 : i32
    %c0_i32_1 = arith.constant 0 : i32
    return %c0_i32, %c0_i32_0 : i32, i32
  }
  func.func @transform_5(%arg0: i32) -> (i32, i32) {
    %c0_i32 = arith.constant 0 : i32
    %c0_i32_0 = arith.constant 0 : i32
    %c0_i32_1 = arith.constant 0 : i32
    return %c0_i32, %c0_i32_0 : i32, i32
  }
  func.func @transform_6(%arg0: i32) -> (i32, i32) {
    %c0_i32 = arith.constant 0 : i32
    %c0_i32_0 = arith.constant 0 : i32
    %c0_i32_1 = arith.constant 0 : i32
    return %c0_i32, %c0_i32_0 : i32, i32
  }
  func.func @transform_7(%arg0: i32) -> (i32, i32) {
    %c0_i32 = arith.constant 0 : i32
    %c0_i32_0 = arith.constant 0 : i32
    %c0_i32_1 = arith.constant 0 : i32
    return %c0_i32, %c0_i32_0 : i32, i32
  }
  func.func @transform_8(%arg0: i32) -> (i32, i32, i32) {
    %c0_i32 = arith.constant 0 : i32
    %c0_i32_0 = arith.constant 0 : i32
    %c0_i32_1 = arith.constant 0 : i32
    return %arg0, %c0_i32, %c0_i32_0 : i32, i32, i32
  }
}

</mosaic_0001>

<bundles_post_ra>
// kernel: encoder_layer_forward.3
= control target key start
LH: loop header
LB: loop body
LE: loop exit
PB: predicated region body
PF: predicated region fallthrough
CT: control target
= control target key end

     0   :  { %10 = vsyncpa [#allocation3], 0  ;;  %s904_s0 = inlined_call_operand.vmem [shape: f32[2,8,32], index: 0, kind: input, shape index: {}]   ;;  %s905_s1 = inlined_call_operand.vmem [shape: f32[32,128], index: 1, kind: input, shape index: {}]   ;;  %s906_s2 = inlined_call_operand.vmem [shape: f32[1,128], index: 2, kind: input, shape index: {}]   ;;  %s907_s3 = inlined_call_operand.vmem [shape: f32[128,32], index: 3, kind: input, shape index: {}]   ;;  %s908_s4 = inlined_call_operand.vmem [shape: f32[1,32], index: 4, kind: input, shape index: {}]   ;;  %s909_s5 = inlined_call_operand.hbm [shape: f32[2,8,32], index: 5, kind: output, shape index: {}]  }
   0x1   :  { %12 = vsyncpa [#allocation3 + $0x1], 0  ;;  %s721_s18 = smov 0   ;;  %s723_s19 = smov 0  }
   0x2   :  { %s725_s20 = smov 0   ;;  %s727_s21 = smov 0  }
   0x3 LB: > { %s742_s22 = sadd.s32 4294967295, %s686_s21   ;;  %s500_s23 = sadd.s32 4294967294, %s686_s21   ;;  %s686_s21 = sphi %s727_s21, %s915_s21   ;;  %s682_s20 = sphi %s725_s20, %s914_s20   ;;  %s678_s19 = sphi %s723_s19, %s913_s19   ;;  %s674_s18 = sphi %s721_s18, %s912_s18  }
   0x4   : > { %s746_s24 = sadd.s32 1, %s686_s21   ;;  %s135_s25 = sadd.s32 1, %s682_s20 }
   0x5   : > { %s132_s26 = ssub.s32 %s686_s21, %s746_s24  ;;  %p145_p0 = scmp.ne.s32.totalorder %s682_s20, %s678_s19 }
   0x6   : > { %p133_p1 = scmp.eq.s32.totalorder %s132_s26, 0  ;;  %p146_p2 = scmp.eq.s32.totalorder %s742_s22, 1 }
   0x7   : > { %p151_p3 = scmp.ne.s32.totalorder %s678_s19, %s674_s18  ;;  %p152_p4 = scmp.eq.s32.totalorder %s500_s23, 1 }
   0x8   : > { %s757_s27 = scalar_select %p133_p1, %s682_s20, %s135_s25  }
   0x9   : > { %p759_p5 = por %p146_p2, %p145_p0  ;;  %p763_p6 = por %p152_p4, %p151_p3 }
   0xa   : > { %p503_p7 = scmp.ge.s32.totalorder %s686_s21, 1  ;;  %p189_p8 = scmp.lt.s32.totalorder %s686_s21, 3 }
   0xc   : > { %p190_p9 = pnand %p503_p7, %p189_p8 }
   0xd   : > { %p216_p10 = scmp.lt.s32.totalorder (!%p190_p9), %s742_s22, 1  ;;  %s213_s26 = sand.u32 (!%p190_p9), 1, %s678_s19  }
   0xe   : > { %193 = sbr.rel (%p190_p9) target bundleno = 482 (0x1e2), region = 40  ;;  %s504_s30 = sshll.u32 (!%p190_p9), %s213_s26, 3 }
   0xf   : > { %s510_s8 = sshll.u32 (!%p190_p9), %s742_s22, 7  ;;  %s428_s14 = scalar_lea.sflag (!%p190_p9), [#allocation3], %s213_s26 }
  0x10   : > { %s868_s13 = scalar_lea.hbm (!%p190_p9), %s909_s5, %s510_s8 }
  0x13   : > { %v224_v0 = vld [vmem:[%s905_s1 + $0x18] sm:$0xff]  ;;  %v688_v1 = vmov 0.0   ;;  %v223_v2 = vld [vmem:[%s905_s1 + $0x10] sm:$0xff]  ;;  %vm689_vm0 = vmmov 0   ;;  %s217_s9 = scalar_select %p216_p10, %s742_s22, 1  ;;  %v222_v3 = vld [vmem:[%s905_s1 + $0x8] sm:$0xff] }
  0x14   : > { %535 = vmatprep.subr.mxu0 %v688_v1  ;;  %543 = vmatprep.mubr.msk.f32.mxu0 %vm689_vm0, %v688_v1  ;;  %v221_v4 = vld [vmem:[%s905_s1] sm:$0xff]  ;;  %vm232_vm1 = vcmask 261120   ;;  %v348_v6 = vld [vmem:[%s907_s3 + $0x78] sm:$0xff]  ;;  %v347_v7 = vld [vmem:[%s907_s3 + $0x70] sm:$0xff]  ;;  %s690_s22 = smov [#allocation2]  }
  0x15   : > { %536 = vmatpush3.msra.mxu0 %v224_v0  ;;  %546 = vmatprep.subr.mxu1 %v688_v1  ;;  %s505_s12 = sshll.u32 %s217_s9, 3  ;;  %v346_v8 = vld [vmem:[%s907_s3 + $0x68] sm:$0xff]  ;;  %v345_v9 = vld [vmem:[%s907_s3 + $0x60] sm:$0xff]  ;;  %v344_v10 = vld [vmem:[%s907_s3 + $0x58] sm:$0xff]  ;;  %s215_s9 = scalar_lea.vmem [#allocation2], %s504_s30 }
  0x16   : > { %537 = vmatprep.subr.mxu0 %v688_v1  ;;  %578 = vmatprep.mubr.msk.f32.mxu1 %vm689_vm0, %v688_v1  ;;  %s219_s17 = scalar_lea.vmem %s904_s0, %s505_s12  ;;  %v343_v11 = vld [vmem:[%s907_s3 + $0x50] sm:$0xff]  ;;  %v342_v12 = vld [vmem:[%s907_s3 + $0x48] sm:$0xff]  ;;  %v341_v13 = vld [vmem:[%s907_s3 + $0x40] sm:$0xff]  ;;  %s441_s10 = sshll.u32 %s215_s9, 4  ;;  %s442_s10 = int_to_ptr.vmem [resolvable:$true] %s441_s10 }
  0x17   : > { %538 = vmatpush3.msra.mxu0 %v223_v2  ;;  %v220_v5 = vld [vmem:[%s219_s17] sm:$0xff]  ;;  %547 = vmatpush3.msra.mxu1 %v348_v6  ;;  %v340_v14 = vld [vmem:[%s907_s3 + $0x38] sm:$0xff]  ;;  %v339_v15 = vld [vmem:[%s907_s3 + $0x30] sm:$0xff]  ;;  %s626_s15 = scalar_lea.vmem %s442_s10, 128  ;;  %s630_s16 = sshll.u32 %s690_s22, 4  ;;  %s631_s16 = int_to_ptr.vmem [resolvable:$false] %s630_s16 }
  0x18   : > { %539 = vmatprep.subr.mxu0 %v688_v1  ;;  %548 = vmatprep.subr.mxu1 %v688_v1  ;;  %v338_v16 = vld [vmem:[%s907_s3 + $0x28] sm:$0xff]  ;;  %v337_v17 = vld [vmem:[%s907_s3 + $0x20] sm:$0xff]  ;;  %v336_v18 = vld [vmem:[%s907_s3 + $0x18] sm:$0xff]  ;;  %p627_p11 = scmp.ne.s32.totalorder %s442_s10, %s626_s15  ;;  %s632_s17 = scalar_lea.vmem %s631_s16, 256 }
  0x19   : > { %540 = vmatpush3.msra.mxu0 %v222_v3  ;;  %549 = vmatpush3.msra.mxu1 %v347_v7  ;;  %v335_v19 = vld [vmem:[%s907_s3 + $0x10] sm:$0xff]  ;;  %v334_v20 = vld [vmem:[%s907_s3 + $0x8] sm:$0xff]  ;;  %v333_v21 = vld [vmem:[%s907_s3] sm:$0xff]  ;;  %p633_p0 = scmp.lt.s32.totalorder %s442_s10, %s631_s16  ;;  %p634_p1 = scmp.lt.s32.totalorder %s632_s17, %s626_s15 }
  0x1a   : > { %541 = vmatprep.subr.mxu0 %v688_v1  ;;  %550 = vmatprep.subr.mxu1 %v688_v1  ;;  %v506_v22 = vld [vmem:[%s906_s2] ss:$0 sm:$0xff]  ;;  %p628_p12 = pnand %p627_p11, %p759_p5 }
  0x1b   : > { %542 = vmatpush3.msra.mxu0 %v221_v4  ;;  %551 = vmatpush3.msra.mxu1 %v346_v8  ;;  %v508_v51 = vld [vmem:[%s908_s4] ss:$0 sm:$0xff]  ;;  %p635_p2 = por %p634_p1, %p633_p0 }
  0x1c   : > { %544 = vmatmul.mubr.msk.f32.vlgmr.msra.gmra.mxu0 %vm232_vm1, %v220_v5  ;;  %552 = vmatprep.subr.mxu1 %v688_v1  ;;  %p629_p13 = pneg %p628_p12 }
  0x1d   : > { %553 = vmatpush3.msra.mxu1 %v345_v9 }
  0x1e   : > { %554 = vmatprep.subr.mxu1 %v688_v1  ;;  %p636_p3 = pnand %p635_p2, %p629_p13 }
  0x1f   : > { %555 = vmatpush3.msra.mxu1 %v344_v10 }
  0x20   : > { %556 = vmatprep.subr.mxu1 %v688_v1 }
  0x21   : > { %557 = vmatpush3.msra.mxu1 %v343_v11 }
  0x22   : > { %558 = vmatprep.subr.mxu1 %v688_v1 }
  0x23   : > { %559 = vmatpush3.msra.mxu1 %v342_v12 }
  0x24   : > { %560 = vmatprep.subr.mxu1 %v688_v1 }
  0x25   : > { %561 = vmatpush3.msra.mxu1 %v341_v13 }
  0x26   : > { %562 = vmatprep.subr.mxu1 %v688_v1 }
  0x27   : > { %563 = vmatpush3.msra.mxu1 %v340_v14 }
  0x28   : > { %564 = vmatprep.subr.mxu1 %v688_v1 }
  0x29   : > { %565 = vmatpush3.msra.mxu1 %v339_v15 }
  0x2a   : > { %566 = vmatprep.subr.mxu1 %v688_v1 }
  0x2b   : > { %567 = vmatpush3.msra.mxu1 %v338_v16 }
  0x2c   : > { %568 = vmatprep.subr.mxu1 %v688_v1 }
  0x2d   : > { %569 = vmatpush3.msra.mxu1 %v337_v17 }
  0x2e   : > { %570 = vmatprep.subr.mxu1 %v688_v1 }
  0x2f   : > { %571 = vmatpush3.msra.mxu1 %v336_v18 }
  0x30   : > { %572 = vmatprep.subr.mxu1 %v688_v1 }
  0x31   : > { %573 = vmatpush3.msra.mxu1 %v335_v19 }
  0x32   : > { %574 = vmatprep.subr.mxu1 %v688_v1 }
  0x33   : > { %575 = vmatpush3.msra.mxu1 %v334_v20 }
  0x34   : > { %576 = vmatprep.subr.mxu1 %v688_v1 }
  0x35   : > { %577 = vmatpush3.msra.mxu1 %v333_v21 }
  0xdc   : > { %v302_v23 = vpop.f32.mrf.mxu0 }
  0xdd   : > { %v303_v24 = vadd.f32 %v506_v22, %v302_v23 }
  0xde   : > { %v545_v25 = vpop.f32.mrf.mxu0 }
  0xdf   : > { %v307_v26 = vmul.f32 0.70710677, %v303_v24  ;;  %v306_v48 = vmul.f32 0.5, %v303_v24 }
  0xe1   : > { %v308_v27 = vand.u32 2147483647, %v307_v26  ;;  %vm328_vm2 = vcmp.lt.f32.partialorder %v307_v26, 0.0 }
  0xe3   : > { %v309_v28 = vmul.f32 0.3275911, %v308_v27  ;;  %v322_v30 = vmul.f32 %v308_v27, %v308_v27 }
  0xe5   : > { %v310_v29 = vadd.f32 1.0, %v309_v28  ;;  %v323_v31 = vsub.f32 0.0, %v322_v30 }
  0xe7   : > { %622 = vrcp.f32 %v310_v29  ;;  %v324_v33 = vmul.f32 1.442695, %v323_v31 }
  0xe9   : > { %624 = vpow2.f32 %v324_v33 }
  0xf4   : > { %v623_v32 = vpop.eup %622 }
  0xf5   : > { %v313_v34 = vmul.f32 1.0614054, %v623_v32 }
  0xf6   : > { %v625_v43 = vpop.eup %624 }
  0xf7   : > { %v314_v35 = vadd.f32 -1.4531521, %v313_v34 }
  0xf9   : > { %v315_v36 = vmul.f32 %v623_v32, %v314_v35 }
  0xfb   : > { %v316_v37 = vadd.f32 1.4214138, %v315_v36 }
  0xfd   : > { %v317_v38 = vmul.f32 %v623_v32, %v316_v37 }
  0xff   : > { %v318_v39 = vadd.f32 -0.28449672, %v317_v38 }
 0x101   : > { %v319_v40 = vmul.f32 %v623_v32, %v318_v39 }
 0x103   : > { %v320_v41 = vadd.f32 0.2548296, %v319_v40 }
 0x105   : > { %v321_v42 = vmul.f32 %v623_v32, %v320_v41 }
 0x107   : > { %v326_v44 = vmul.f32 %v625_v43, %v321_v42 }
 0x109   : > { %v327_v45 = vsub.f32 1.0, %v326_v44 }
 0x10b   : > { %v329_v46 = vsub.f32 0.0, %v327_v45 }
 0x10d   : > { %v330_v47 = vsel %vm328_vm2, %v329_v46, %v327_v45 }
 0x10e   : > { %v331_v49 = vadd.f32 1.0, %v330_v47 }
 0x110   : > { %v332_v50 = vmul.f32 %v331_v49, %v306_v48 }
 0x112   : > { %579 = vmatmul.mubr.f32.vlgmr.msra.gmra.mxu1 %v332_v50 }
 0x1d2   : > { %v422_v52 = vpop.f32.mrf.mxu1 }
 0x1d3   : > { %v423_v53 = vadd.f32 %v508_v51, %v422_v52 }
 0x1d4   : > { %v580_v54 = vpop.f32.mrf.mxu1 }
 0x1d5   : > { %426 = vst.msk [vmem:[%s215_s9] sm:$0xff] %vm232_vm1, %v423_v53 }
 0x1d6   : > { %639 = shalt.err (!%p636_p3)
}
 0x1d7   : > { %s640_s23 = scalar_lea.hbm %s868_s13, 128  ;;  %s644_s30 = scalar_lea.hbm %s909_s5, 256 }
 0x1d8   : > { %p641_p4 = scmp.ne.s32.totalorder %s868_s13, %s640_s23  ;;  %p645_p9 = scmp.lt.s32.totalorder %s868_s13, %s909_s5 }
 0x1d9   : > { %p646_p10 = scmp.lt.s32.totalorder %s644_s30, %s640_s23 }
 0x1da   : > { %p642_p7 = pnand %p641_p4, %p759_p5 }
 0x1db   : > { %p647_p11 = por %p646_p10, %p645_p9 }
 0x1dc   : > { %p643_p8 = pneg %p642_p7 }
 0x1de   : > { %p648_p12 = pnand %p647_p11, %p643_p8 }
 0x1e0   : > { %651 = shalt.err (!%p648_p12)
}
 0x1e1   : > { %581 = dma.vmem_to_hbm [thread:$0]  (%p759_p5), %s442_s10, 128, %s868_s13, %s428_s14  }
 0x1e2 PF: > { %p587_p13 = scmp.ge.s32.totalorder %s686_s21, 2  ;;  %s453_s8 = sand.u32 1, %s674_s18  }
 0x1e3   : > { %s454_s9 = scalar_lea.sflag [#allocation3], %s453_s8 }
 0x1e4   : > { %p584_p0 = pnand %p587_p13, %p763_p6 }
 0x1e6   : > { %p585_p1 = pneg %p584_p0 }
 0x1e8   : > { %669 = dma.done.wait (%p585_p1), %s454_s9, 128  }
 0x1e9   : > { %671 = vsyncadd (%p585_p1), %s454_s9, 4294967168  ;;  %p15_p2 = scmp.ge.s32.totalorder %s746_s24, 4   ;;  %s912_s18 = smov %s678_s19 }
 0x1ea   : > { %s913_s19 = smov %s682_s20  ;;  %s914_s20 = smov %s757_s27 }
 0x1eb   : > { %s915_s21 = smov %s746_s24  ;;  %17 = sbr.rel (!%p15_p2) target bundleno = 3 (0x3), region = 75 }
 0x1f0   :  { %459 = vsyncpa [#allocation3], 1 }
 0x1f1   :  { %461 = vsyncpa [#allocation3 + $0x1], 1 }

// kernel: encoder_layer_forward.2
= control target key start
LH: loop header
LB: loop body
LE: loop exit
PB: predicated region body
PF: predicated region fallthrough
CT: control target
= control target key end

     0   :  { %s1119_s27 = smov 0   ;;  %s1309_s0 = inlined_call_operand.vmem [shape: f32[2,8,32], index: 0, kind: input, shape index: {}]   ;;  %s1310_s1 = inlined_call_operand.vmem [shape: s8[2,8,8], index: 1, kind: input, shape index: {}]   ;;  %s1311_s2 = inlined_call_operand.vmem [shape: f32[32,384], index: 2, kind: input, shape index: {}]   ;;  %s1312_s3 = inlined_call_operand.vmem [shape: f32[1,384], index: 3, kind: input, shape index: {}]   ;;  %s1313_s4 = inlined_call_operand.vmem [shape: f32[128,32], index: 4, kind: input, shape index: {}]   ;;  %s1314_s5 = inlined_call_operand.vmem [shape: f32[1,32], index: 5, kind: input, shape index: {}]   ;;  %s1315_s6 = inlined_call_operand.vmem [shape: f32[1,32], index: 6, kind: input, shape index: {}]   ;;  %s1316_s7 = inlined_call_operand.vmem [shape: f32[1,32], index: 7, kind: input, shape index: {}]   ;;  %s1317_s8 = inlined_call_operand.vmem [shape: f32[2,8,32], index: 8, kind: output, shape index: {}]  }
   0x1 LB: > { %s923_s28 = sadd.s32 4294967295, %s1069_s27   ;;  %p927_p0 = scmp.ge.s32.totalorder %s1069_s27, 1  ;;  %s1069_s27 = sphi %s1119_s27, %s18_s27  }
   0x2   : > { %p270_p1 = scmp.lt.s32.totalorder %s1069_s27, 3 }
   0x4   : > { %p271_p2 = pnand %p927_p0, %p270_p1 }
   0x5   : > { %p306_p3 = scmp.lt.s32.totalorder (!%p271_p2), %s923_s28, 1  ;;  %s1073_s17 = smov (!%p271_p2), 64  }
   0x6   : > { %274 = sbr.rel (%p271_p2) target bundleno = 1769 (0x6e9), region = 52 }
   0xb   : > { %v333_v0 = vld [vmem:[%s1311_s2 + $0x50] sm:$0xff]  ;;  %v332_v1 = vld [vmem:[%s1311_s2 + $0x48] sm:$0xff]  ;;  %v330_v2 = vld [vmem:[%s1311_s2 + $0x38] sm:$0xff]  ;;  %v1071_v4 = vmov 0.0   ;;  %s1319_s28 = smov (!%p306_p3, %s923_s28), 1  ;;  %vm352_vm0 = vcmask 261120   ;;  %v337_v14 = vlaneseq }
   0xc   : > { %380 = vmatprep.subr.mxu0 %v333_v0  ;;  %v329_v3 = vld [vmem:[%s1311_s2 + $0x30] sm:$0xff]  ;;  %420 = vmatprep.mubr.f32.mxu0 %v1071_v4  ;;  %v327_v5 = vld [vmem:[%s1311_s2 + $0x20] sm:$0xff]  ;;  %v326_v6 = vld [vmem:[%s1311_s2 + $0x18] sm:$0xff]  ;;  %s928_s21 = sshll.u32 %s1319_s28, 3  ;;  %vm1072_vm1 = vmmov 0   ;;  %vm500_vm2 = vcmask 523264  }
   0xd   : > { %381 = vmatpush1.msra.mxu0 %v332_v1  ;;  %989 = vmatprep.subr.bf16.mxu1 %v1071_v4  ;;  %v324_v7 = vld [vmem:[%s1311_s2 + $0x8] sm:$0xff]  ;;  %v323_v8 = vld [vmem:[%s1311_s2] sm:$0xff]  ;;  %s309_s26 = scalar_lea.vmem %s1309_s0, %s928_s21  ;;  %v334_v10 = vld [vmem:[%s1311_s2 + $0x58] sm:$0xff]  ;;  %v338_v15 = vshrl.u32 %v337_v14, 7  ;;  %vm564_vm3 = vcmask 1043456   ;;  %s929_s18 = sshll.u32 %s1319_s28, 1 }
   0xe   : > { %382 = vmatprep.subr.mxu0 %v330_v2  ;;  %v1161_v9 = vld [vmem:[%s309_s26] sm:$0xff]  ;;  %v328_v12 = vld [vmem:[%s1311_s2 + $0x28] sm:$0xff]  ;;  %v325_v13 = vld [vmem:[%s1311_s2 + $0x10] sm:$0xff]  ;;  %991 = vmatprep.mubr.msk.bf16.mxu1 %vm1072_vm1, %v1071_v4  ;;  %s313_s22 = scalar_lea.vmem %s1310_s1, %s929_s18  ;;  %vm550_vm5 = vcmask 64512   ;;  %vm730_vm6 = vcmask 1048064   ;;  %s317_s26 = scalar_lea.vmem %s1317_s8, %s928_s21 }
   0xf   : > { %383 = vmatpush1.msra.mxu0 %v329_v3  ;;  %v331_v11 = vld [vmem:[%s1311_s2 + $0x40] sm:$0xff]  ;;  %v339_v16 = vsub.s32 0, %v338_v15  ;;  %v343_v18 = vsub.s32 1, %v338_v15  ;;  %v347_v28 = vsub.s32 2, %v338_v15  ;;  %v748_v14 = vld [vmem:[%s1313_s4 + $0x78] sm:$0xff]  ;;  %v747_v15 = vld [vmem:[%s1313_s4 + $0x70] sm:$0xff] }
  0x10   : > { %384 = vmatprep.subr.mxu0 %v327_v5  ;;  %v335_v17 = vld [vmem:[%s1312_s3] sm:$0x7] }
  0x11   : > { %385 = vmatpush1.msra.mxu0 %v326_v6  ;;  %v340_v19 = vrot.slane %v335_v17, %v339_v16  ;;  %v344_v20 = vrot.slane %v335_v17, %v343_v18  ;;  %v348_v29 = vrot.slane %v335_v17, %v347_v28  ;;  %v320_v35 = vld [vmem:[%s313_s22] sm:$0x3]  ;;  %v746_v16 = vld [vmem:[%s1313_s4 + $0x68] sm:$0xff]  ;;  %v744_v18 = vld [vmem:[%s1313_s4 + $0x58] sm:$0xff] }
  0x12   : > { %386 = vmatprep.subr.mxu0 %v324_v7  ;;  %v321_v36 = vunpack.c.0.s8 %v320_v35  ;;  %v745_v17 = vld [vmem:[%s1313_s4 + $0x60] sm:$0xff]  ;;  %v735_v28 = vld [vmem:[%s1313_s4 + $0x10] sm:$0xff] }
  0x13   : > { %387 = vmatpush1.msra.mxu0 %v323_v8 }
  0x14   : > { %931 = vmatmul.mubr.msk.f32.vlgmr.msra.gmra.mxu0 %vm352_vm0, %v1161_v9  ;;  %972 = vmatprep.subr.mxu0 %v1071_v4  ;;  %v322_v37 = vcvt.s32.f32 %v321_v36 }
  0x15   : > { %973 = vmatpush3.msra.mxu0 %v334_v10  ;;  %980 = vmatprep.mubr.msk.f32.mxu0 %vm1072_vm1, %v1071_v4 }
  0x16   : > { %974 = vmatprep.subr.mxu0 %v1071_v4  ;;  %vm548_vm4 = vcmp.ne.f32.partialorder %v322_v37, 0.0 }
  0x17   : > { %975 = vmatpush3.msra.mxu0 %v331_v11 }
  0x18   : > { %976 = vmatprep.subr.mxu0 %v1071_v4 }
  0x19   : > { %977 = vmatpush3.msra.mxu0 %v328_v12 }
  0x1a   : > { %978 = vmatprep.subr.mxu0 %v1071_v4 }
  0x1b   : > { %979 = vmatpush3.msra.mxu0 %v325_v13 }
  0x1c   : > { %981 = vmatmul.mubr.msk.f32.vlgmr.msra.gmra.mxu0 %vm352_vm0, %v1161_v9  ;;  %983 = vmatprep.subr.bf16.mxu0 %v1071_v4 }
  0x1d   : > { %985 = vmatprep.mubr.msk.bf16.mxu0 %vm1072_vm1, %v1071_v4 }
  0xd4   : > { %v422_v21 = vpop.f32.mrf.mxu0 }
  0xd5   : > { %v423_v22 = vadd.f32 %v422_v21, %v340_v19  ;;  %v743_v19 = vld [vmem:[%s1313_s4 + $0x50] sm:$0xff]  ;;  %v741_v21 = vld [vmem:[%s1313_s4 + $0x40] sm:$0xff] }
  0xd6   : > { %v424_v23 = vpop.f32.mrf.mxu0 }
  0xd7   : > { %v497_v24 = vpack.c.bf16 %v423_v22, %v423_v22  ;;  %v425_v25 = vadd.f32 %v424_v23, %v344_v20  ;;  %v742_v20 = vld [vmem:[%s1313_s4 + $0x48] sm:$0xff]  ;;  %v740_v22 = vld [vmem:[%s1313_s4 + $0x38] sm:$0xff]  ;;  %v739_v23 = vld [vmem:[%s1313_s4 + $0x30] sm:$0xff] }
  0xd9   : > { %v498_v26 = vpack.c.bf16 %v425_v25, %v425_v25  ;;  %612 = vrot.lane.b32.xlu1 %v497_v24, %s1073_s17  ;;  %v737_v25 = vld [vmem:[%s1313_s4 + $0x20] sm:$0xff] }
  0xdb   : > { %v505_v27 = vsel %vm500_vm2, %v498_v26, 0 }
  0xdc   : > { %984 = vmatpush3.bf16.xpose.msra.mxu0 %v505_v27  ;;  %v493_v30 = vpop.f32.mrf.mxu0  ;;  %v736_v27 = vld [vmem:[%s1313_s4 + $0x18] sm:$0xff] }
  0xdd   : > { %1001 = vmatprep.subr.bf16.mxu0 %v1071_v4  ;;  %v494_v31 = vadd.f32 %v493_v30, %v348_v29  ;;  %v734_v29 = vld [vmem:[%s1313_s4 + $0x8] sm:$0xff]  ;;  %v733_v30 = vld [vmem:[%s1313_s4] sm:$0xff] }
  0xde   : > { %v982_v32 = vpop.f32.mrf.mxu0 }
  0xdf   : > { %v499_v33 = vpack.c.bf16 %v494_v31, %v494_v31 }
  0xe1   : > { %v566_v34 = vsel %vm564_vm3, %v499_v33, 0 }
  0xe2   : > { %990 = vmatpush3.bf16.msra.mxu1 %v566_v34 }
  0xe3   : > { %986 = vmatmul.mubr.msk.bf16.vlgmr.msra.gmra.mxu0 %vm500_vm2, %v497_v24  ;;  %995 = vmatprep.subr.bf16.mxu1 %v1071_v4  ;;  %v738_v24 = vld [vmem:[%s1313_s4 + $0x28] sm:$0xff] }
  0xe4   : > { %1003 = vmatprep.mubr.msk.bf16.mxu0 %vm1072_vm1, %v1071_v4 }
 0x14b   : > { %v613_v54 = vpop.permute.xlu1 %612 }
 0x1a3   : > { %v541_v38 = vpop.f32.mrf.mxu0 }
 0x1a4   : > { %v547_v39 = vmul.f32 0.125, %v541_v38 }
 0x1a5   : > { %v987_v40 = vpop.f32.mrf.mxu0 }
 0x1a6   : > { %v549_v41 = vsel %vm548_vm4, -1e+09, %v547_v39  ;;  %v937_v39 = vld [vmem:[%s1314_s5] ss:$0 sm:$0xff] }
 0x1a7   : > { %v544_v42 = vpop.f32.mrf.mxu0  ;;  %v551_v43 = vsel %vm550_vm5, %v549_v41, -inf }
 0x1a8   : > { %552 = vmax.xlane.f32.xlu0 %v551_v43 }
 0x1a9   : > { %v988_v44 = vpop.f32.mrf.mxu0 }
 0x1be   : > { %615 = vrot.lane.b32.xlu0 %v498_v26, %s1073_s17 }
 0x1c2   : > { %676 = vrot.lane.b32.xlu0 %v499_v33, %s1073_s17 }
 0x231   : > { %v553_v45 = vpop.xlane.xlu0 %552 }
 0x232   : > { %v554_v46 = vsub.f32 %v549_v41, %v553_v45 }
 0x234   : > { %v555_v47 = vmul.f32 1.442695, %v554_v46 }
 0x235   : > { %v616_v48 = vpop.permute.xlu0 %615 }
 0x236   : > { %1053 = vpow2.f32 %v555_v47  ;;  %v621_v53 = vsel %vm500_vm2, %v616_v48, 0 }
 0x239   : > { %v677_v49 = vpop.permute.xlu0 %676 }
 0x23a   : > { %v682_v50 = vsel %vm564_vm3, %v677_v49, 0 }
 0x23b   : > { %1002 = vmatpush3.bf16.msra.mxu0 %v682_v50 }
 0x243   : > { %v1054_v51 = vpop.eup %1053 }
 0x244   : > { %v560_v52 = vpack.c.bf16 %v1054_v51, %v1054_v51  ;;  %v557_v2 = vsel %vm550_vm5, %v1054_v51, 0.0 }
 0x246   : > { %992 = vmatmul.mubr.msk.bf16.vlgmr.msra.gmra.mxu1 %vm550_vm5, %v560_v52 }
 0x247   : > { %996 = vmatpush3.bf16.xpose.msra.mxu1 %v621_v53  ;;  %997 = vmatprep.mubr.msk.bf16.mxu1 %vm1072_vm1, %v1071_v4 }
 0x248   : > { %1007 = vmatprep.subr.mxu1 %v1071_v4 }
 0x24e   : > { %998 = vmatmul.mubr.msk.bf16.vlgmr.msra.gmra.mxu1 %vm500_vm2, %v613_v54  ;;  %v939_v54 = vld [vmem:[%s1316_s7] ss:$0 sm:$0xff] }
 0x24f   : > { %1039 = vmatprep.mubr.msk.f32.mxu1 %vm1072_vm1, %v1071_v4  ;;  %1008 = vmatpush3.msra.mxu1 %v748_v14 }
 0x250   : > { %1009 = vmatprep.subr.mxu1 %v1071_v4 }
 0x251   : > { %1010 = vmatpush3.msra.mxu1 %v747_v15 }
 0x252   : > { %1011 = vmatprep.subr.mxu1 %v1071_v4 }
 0x253   : > { %1012 = vmatpush3.msra.mxu1 %v746_v16 }
 0x254   : > { %1013 = vmatprep.subr.mxu1 %v1071_v4 }
 0x255   : > { %1014 = vmatpush3.msra.mxu1 %v745_v17 }
 0x256   : > { %1015 = vmatprep.subr.mxu1 %v1071_v4 }
 0x257   : > { %1016 = vmatpush3.msra.mxu1 %v744_v18 }
 0x258   : > { %1017 = vmatprep.subr.mxu1 %v1071_v4 }
 0x259   : > { %1018 = vmatpush3.msra.mxu1 %v743_v19 }
 0x25a   : > { %1019 = vmatprep.subr.mxu1 %v1071_v4 }
 0x25b   : > { %1020 = vmatpush3.msra.mxu1 %v742_v20 }
 0x25c   : > { %1021 = vmatprep.subr.mxu1 %v1071_v4 }
 0x25d   : > { %1022 = vmatpush3.msra.mxu1 %v741_v21 }
 0x25e   : > { %1023 = vmatprep.subr.mxu1 %v1071_v4 }
 0x25f   : > { %1024 = vmatpush3.msra.mxu1 %v740_v22 }
 0x260   : > { %1025 = vmatprep.subr.mxu1 %v1071_v4 }
 0x261   : > { %1026 = vmatpush3.msra.mxu1 %v739_v23 }
 0x262   : > { %1027 = vmatprep.subr.mxu1 %v1071_v4 }
 0x263   : > { %1028 = vmatpush3.msra.mxu1 %v738_v24 }
 0x264   : > { %1029 = vmatprep.subr.mxu1 %v1071_v4 }
 0x265   : > { %1030 = vmatpush3.msra.mxu1 %v737_v25 }
 0x266   : > { %1031 = vmatprep.subr.mxu1 %v1071_v4 }
 0x267   : > { %1032 = vmatpush3.msra.mxu1 %v736_v27 }
 0x268   : > { %1033 = vmatprep.subr.mxu1 %v1071_v4 }
 0x269   : > { %1034 = vmatpush3.msra.mxu1 %v735_v28 }
 0x26a   : > { %1035 = vmatprep.subr.mxu1 %v1071_v4 }
 0x26b   : > { %1036 = vmatpush3.msra.mxu1 %v734_v29 }
 0x26c   : > { %1037 = vmatprep.subr.mxu1 %v1071_v4 }
 0x26d   : > { %1038 = vmatpush3.msra.mxu1 %v733_v30 }
 0x306   : > { %v602_v55 = vpop.f32.mrf.mxu1 }
 0x308   : > { %v993_v56 = vpop.f32.mrf.mxu1 }
 0x30a   : > { %v605_v57 = vpop.f32.mrf.mxu1 }
 0x30c   : > { %v994_v58 = vpop.f32.mrf.mxu1 }
 0x30e   : > { %v657_v59 = vpop.f32.mrf.mxu1 }
 0x30f   : > { %v663_v60 = vmul.f32 0.125, %v657_v59 }
 0x310   : > { %v999_v61 = vpop.f32.mrf.mxu1 }
 0x311   : > { %v664_v62 = vsel %vm548_vm4, -1e+09, %v663_v60 }
 0x312   : > { %v660_v63 = vpop.f32.mrf.mxu1  ;;  %v665_v0 = vsel %vm550_vm5, %v664_v62, -inf }
 0x313   : > { %666 = vmax.xlane.f32.xlu1 %v665_v0 }
 0x314   : > { %v1000_v1 = vpop.f32.mrf.mxu1 }
 0x317   : > { %558 = vadd.xlane.f32.xlu1 %v557_v2 }
 0x39c   : > { %v667_v3 = vpop.xlane.xlu1 %666 }
 0x39d   : > { %v668_v5 = vsub.f32 %v664_v62, %v667_v3 }
 0x39f   : > { %v669_v6 = vmul.f32 1.442695, %v668_v5 }
 0x3a0   : > { %v559_v7 = vpop.xlane.xlu1 %558 }
 0x3a1   : > { %1055 = vpow2.f32 %v669_v6 }
 0x3a2   : > { %1057 = vrcp.f32 %v559_v7 }
 0x3ae   : > { %v1056_v8 = vpop.eup %1055 }
 0x3af   : > { %v1058_v10 = vpop.eup %1057  ;;  %v671_v11 = vsel %vm550_vm5, %v1056_v8, 0.0  ;;  %v674_v12 = vpack.c.bf16 %v1056_v8, %v1056_v8 }
 0x3b0   : > { %672 = vadd.xlane.f32.xlu0 %v671_v11  ;;  %v609_v13 = vmul.f32 %v1058_v10, %v602_v55 }
 0x3b1   : > { %1004 = vmatmul.mubr.msk.bf16.vlgmr.msra.gmra.mxu0 %vm550_vm5, %v674_v12 }
 0x3b2   : > { %610 = vst.msk [vmem:[#allocation2] sm:$0xff] %vm500_vm2, %v609_v13 }
 0x439   : > { %v673_v26 = vpop.xlane.xlu0 %672 }
 0x43a   : > { %1059 = vrcp.f32 %v673_v26 }
 0x447   : > { %v1060_v31 = vpop.eup %1059 }
 0x471   : > { %v718_v32 = vpop.f32.mrf.mxu0 }
 0x472   : > { %v725_v33 = vmul.f32 %v1060_v31, %v718_v32 }
 0x473   : > { %v1005_v34 = vpop.f32.mrf.mxu0 }
 0x474   : > { %727 = vrot.lane.b32.xlu1 %v725_v33, %s1073_s17 }
 0x475   : > { %v721_v35 = vpop.f32.mrf.mxu0 }
 0x477   : > { %v1006_v36 = vpop.f32.mrf.mxu0 }
 0x4e6   : > { %v728_v37 = vpop.permute.xlu1 %727 }
 0x4e7   : > { %731 = vst.msk [vmem:[#allocation2] sm:$0xff] %vm730_vm6, %v728_v37 }
 0x4ee   : > { %v732_v38 = vld [vmem:[#allocation2] sm:$0xff] }
 0x4ef   : > { %1040 = vmatmul.mubr.f32.vlgmr.msra.gmra.mxu1 %v732_v38 }
 0x5af   : > { %v822_v40 = vpop.f32.mrf.mxu1 }
 0x5b0   : > { %v823_v4 = vadd.f32 %v937_v39, %v822_v40 }
 0x5b1   : > { %v1041_v41 = vpop.f32.mrf.mxu1 }
 0x5b2   : > { %v826_v42 = vadd.f32 %v823_v4, %v1161_v9  ;;  %v938_v9 = vld [vmem:[%s1315_s6] ss:$0 sm:$0xff] }
 0x5b4   : > { %v827_v43 = vsel %vm352_vm0, %v826_v42, 0.0 }
 0x5b5   : > { %828 = vadd.xlane.f32.xlu0 %v827_v43 }
 0x63e   : > { %v829_v44 = vpop.xlane.xlu0 %828 }
 0x63f   : > { %v831_v45 = vmul.f32 0.03125, %v829_v44 }
 0x641   : > { %v832_v46 = vsub.f32 %v826_v42, %v831_v45 }
 0x643   : > { %v833_v47 = vmul.f32 %v832_v46, %v832_v46 }
 0x645   : > { %v834_v48 = vsel %vm352_vm0, %v833_v47, 0.0 }
 0x646   : > { %835 = vadd.xlane.f32.xlu1 %v834_v48 }
 0x6cf   : > { %v836_v49 = vpop.xlane.xlu1 %835 }
 0x6d0   : > { %v837_v50 = vmul.f32 0.03125, %v836_v49 }
 0x6d2   : > { %v838_v51 = vadd.f32 1e-05, %v837_v50 }
 0x6d4   : > { %1061 = vrsqrt.f32 %v838_v51 }
 0x6e1   : > { %v1062_v52 = vpop.eup %1061 }
 0x6e2   : > { %v840_v53 = vmul.f32 %v1062_v52, %v832_v46 }
 0x6e4   : > { %v848_v55 = vmul.f32 %v938_v9, %v840_v53 }
 0x6e6   : > { %v856_v56 = vadd.f32 %v939_v54, %v848_v55 }
 0x6e8   : > { %857 = vst.msk [vmem:[%s317_s26] sm:$0xff] %vm352_vm0, %v856_v56 }
 0x6e9 PF: > { %s18_s27 = sadd.s32 1, %s1069_s27  }
 0x6ea   : > { %p15_p4 = scmp.ge.s32.totalorder %s18_s27, 4  }
 0x6ec   :  { %17 = sbr.rel (!%p15_p4) target bundleno = 1 (0x1), region = 85 }

</bundles_post_ra>
